<compile_context>
chip_gen: v6e
topology: v6e:2x2x1
jax: 0.10.0
libtpu: 0.0.40
codegen_flags: <defaults>
</compile_context>

<pallas_src>
import functools

import jax
import jax.numpy as jnp
from jax import lax
from jax.experimental import pallas as pl
from jax.experimental.pallas import tpu as pltpu


# ---------------------------------------------------------------------------
# Helpers
# ---------------------------------------------------------------------------
def _zz_t(a, b):
    """a @ b.T without materializing a transpose (contract dim 1 with dim 1)."""
    return lax.dot_general(
        a, b, dimension_numbers=(((1,), (1,)), ((), ())),
        preferred_element_type=jnp.float32)


def _fast_inv(x):
    """EUP approx reciprocal + one Newton step (restores ~f32 accuracy)."""
    r = pl.reciprocal(x, approx=True)
    return r * (2.0 - x * r)


def _vmem_policy():
    """(vmem_limit_bytes, tile_budget_bytes) per TPU generation."""
    phys = None
    try:
        info = pltpu.get_tpu_info()
        phys = getattr(info, "vmem_capacity_bytes", None)
    except Exception:
        phys = None
    if not phys:
        phys = 64 << 20                       # conservative (v7x-sized) default
    limit = min(int(phys * 3 // 4), 112 << 20)
    budget = int(limit * 7 // 8)
    return limit, budget


_TILE_CANDS = (1024, 768, 512, 384, 256, 128)


def _divisor_cands(n_pad):
    c = [t for t in _TILE_CANDS if t <= n_pad and n_pad % t == 0]
    return c or [n_pad]


def _fused_vmem_bytes(n, dp, z_b, adj_b):
    io = 2 * n * dp * z_b + 2 * n * n * adj_b + 2 * n * dp * z_b + 2 * n * n * 4
    temps = 3 * n * n * 4 + 2 * n * dp * 4
    return io + temps + (1 << 20)


def _pass1_vmem_bytes(n_pad, dp, tn1, z_b):
    return (2 * n_pad * dp * z_b + 2 * n_pad * tn1 * 4 + tn1 * dp * 4
            + 2 * 8 * tn1 * 4 + (1 << 20))


def _pass2_vmem_bytes(n_pad, dp, tm, tn, z_b, adj_b):
    resident_z = 2 * n_pad * dp * z_b          # conservatively double-buffered
    adj_in = 2 * tm * tn * adj_b
    inv_in = 2 * 8 * tn * 4
    h_out = 2 * tm * dp * z_b
    alpha_out = 2 * tm * tn * 4
    acc = tm * dp * 4
    temps = 3 * tm * tn * 4 + (tm + tn) * dp * 4
    return (resident_z + adj_in + inv_in + h_out + alpha_out + acc + temps
            + (2 << 20))


def _pick_pass1_tile(n_pad, dp, z_b, budget):
    for tn1 in _divisor_cands(n_pad):
        if _pass1_vmem_bytes(n_pad, dp, tn1, z_b) <= budget:
            return tn1
    return _divisor_cands(n_pad)[-1]


def _pick_pass2_tiles(n_pad, dp, z_b, adj_b, budget):
    cands = _divisor_cands(n_pad)
    best = None
    for tm in cands:
        for tn in cands:
            if _pass2_vmem_bytes(n_pad, dp, tm, tn, z_b, adj_b) > budget:
                continue
            key = (tm * tn, tm)               # prefer biggest tile, then tall tm
            if best is None or key > best[0]:
                best = (key, tm, tn)
    if best is None:
        # TODO(synk): additionally tile the feature dim for extreme N / Dp.
        return cands[-1], cands[-1]
    return best[1], best[2]


# ---------------------------------------------------------------------------
# Fused single-block kernel (whole small problem resident in VMEM).
# ---------------------------------------------------------------------------
def _fused_kernel(z_ref, adj_ref, h_ref, alpha_ref, *, beta, inv_t):
    Z = z_ref[...]                                     # (N, Dp), native dtype
    Zs = Z * inv_t if inv_t != 1.0 else Z              # fold 1/t into operand
    temp = jnp.exp(_zz_t(Zs, Z))                       # (N, N) f32, EUP exp

    # Symmetric logits: column sums == row sums; axis=0 is a sublane reduce and
    # its (1, N) result broadcasts over lanes for free.
    col_sum = jnp.sum(temp, axis=0, keepdims=True)     # (1, N)
    alpha = temp * _fast_inv(col_sum)                  # (N, N)

    # Retire the alpha slab before the second matmul.
    alpha_ref[...] = alpha.astype(alpha_ref.dtype)

    p_adj = alpha * adj_ref[...].astype(jnp.float32)
    h = beta * Z.astype(jnp.float32) + (1.0 - beta) * jnp.dot(
        p_adj.astype(Z.dtype), Z, preferred_element_type=jnp.float32)
    h_ref[...] = h.astype(h_ref.dtype)


# ---------------------------------------------------------------------------
# Tiled two-pass kernels.
# ---------------------------------------------------------------------------
def _denom_kernel(z_ref, inv_ref, *, inv_t, n_valid, tn):
    # For columns j of this tile: denom[j] = sum_i exp(z_i . z_j / t)
    # (== row-sum of row j by symmetry of the logits).
    k = pl.program_id(0)
    c0 = pl.multiple_of(k * tn, tn)
    Zc = z_ref[pl.ds(c0, tn), :]                       # (tn, Dp) col tile
    Zc_s = Zc * inv_t if inv_t != 1.0 else Zc
    temp = jnp.exp(_zz_t(z_ref[...], Zc_s))            # (N_pad, tn) f32
    if z_ref.shape[0] != n_valid:                      # mask zero-padded rows
        rows = lax.broadcasted_iota(jnp.int32, temp.shape, 0)
        temp = jnp.where(rows < n_valid, temp, 0.0)
    s = jnp.sum(temp, axis=0, keepdims=True)           # (1, tn) sublane reduce
    inv_ref[...] = _fast_inv(s)


def _row_kernel(inv_ref, z_ref, adj_ref, h_ref, alpha_ref, acc_ref,
                *, beta, inv_t, tm, tn):
    i = pl.program_id(0)
    k = pl.program_id(1)
    r0 = pl.multiple_of(i * tm, tm)
    c0 = pl.multiple_of(k * tn, tn)
    Zr = z_ref[pl.ds(r0, tm), :]                       # (tm, Dp) row tile
    Zc = z_ref[pl.ds(c0, tn), :]                       # (tn, Dp) col tile
    Zr_s = Zr * inv_t if inv_t != 1.0 else Zr          # fold 1/t into operand

    alpha = jnp.exp(_zz_t(Zr_s, Zc)) * inv_ref[...]    # (tm, tn) * (1, tn)
    alpha_ref[...] = alpha.astype(alpha_ref.dtype)     # retire before matmul

    p_adj = alpha * adj_ref[...].astype(jnp.float32)
    part = jnp.dot(p_adj.astype(Zc.dtype), Zc, preferred_element_type=jnp.float32)

    @pl.when(k == 0)
    def _():
        acc_ref[...] = part

    @pl.when(k > 0)
    def _():
        acc_ref[...] = acc_ref[...] + part

    @pl.when(k == pl.num_programs(1) - 1)
    def _():
        h = beta * Zr.astype(jnp.float32) + (1.0 - beta) * acc_ref[...]
        h_ref[...] = h.astype(h_ref.dtype)


# ---------------------------------------------------------------------------
# Wrapper
# ---------------------------------------------------------------------------
def disentangle_out_layer(Z, adj, *, beta, temperature=1.0,
                          force_tiled=False, row_tile=None, col_tile=None,
                          pass1_tile=None):
    """Pallas TPU forward of Disentangle_out_layer.  Z: (N, D), adj: (N, N)."""
    N, D = Z.shape
    assert adj.shape == (N, N)
    beta = float(beta)
    inv_t = 1.0 / float(temperature)
    vmem_limit, budget = _vmem_policy()

    # Lane-dense feature dim: pad D up to a multiple of 128 with zeros.  Exact:
    # padded columns contribute 0 to Z@Z.T and are sliced off h at the end.
    Dp = ((D + 127) // 128) * 128
    Z_in = Z if Dp == D else jnp.pad(Z, ((0, 0), (0, Dp - D)))

    z_b = jnp.dtype(Z_in.dtype).itemsize
    adj_b = jnp.dtype(adj.dtype).itemsize

    use_fused = (not force_tiled and N <= 256
                 and _fused_vmem_bytes(N, Dp, z_b, adj_b) <= budget)

    if use_fused:
        cost = pl.CostEstimate(
            flops=4 * N * N * Dp + 6 * N * N,
            transcendentals=N * N,
            bytes_accessed=2 * N * Dp * z_b + N * N * adj_b + N * N * 4)
        h, alpha = pl.pallas_call(
            functools.partial(_fused_kernel, beta=beta, inv_t=inv_t),
            out_shape=(jax.ShapeDtypeStruct((N, Dp), Z.dtype),
                       jax.ShapeDtypeStruct((N, N), jnp.float32)),
            grid=(1,),
            in_specs=[pl.BlockSpec((N, Dp), lambda i: (0, 0)),
                      pl.BlockSpec((N, N), lambda i: (0, 0))],
            out_specs=(pl.BlockSpec((N, Dp), lambda i: (0, 0)),
                       pl.BlockSpec((N, N), lambda i: (0, 0))),
            compiler_params=pltpu.CompilerParams(
                dimension_semantics=("arbitrary",),
                vmem_limit_bytes=vmem_limit),
            cost_estimate=cost,
        )(Z_in, adj)
        if Dp != D:
            h = h[:, :D]
        return h, alpha

    # ---------------- tiled two-pass path (any N) ----------------
    N_pad = ((N + 127) // 128) * 128
    Zp = Z_in if N_pad == N else jnp.pad(Z_in, ((0, N_pad - N), (0, 0)))
    adjp = adj if N_pad == N else jnp.pad(adj, ((0, N_pad - N), (0, N_pad - N)))

    def _check_tile(t):
        assert N_pad % t == 0 and t % 128 == 0, \
            "tile must divide padded N and be a multiple of 128"
        return t

    tn1 = _check_tile(pass1_tile) if pass1_tile is not None else \
        _pick_pass1_tile(N_pad, Dp, z_b, budget)
    if row_tile is not None or col_tile is not None:
        tm = _check_tile(row_tile) if row_tile is not None else 128
        tn = _check_tile(col_tile) if col_tile is not None else 128
    else:
        tm, tn = _pick_pass2_tiles(N_pad, Dp, z_b, adj_b, budget)

    params = lambda sem: pltpu.CompilerParams(          # noqa: E731
        dimension_semantics=sem, vmem_limit_bytes=vmem_limit)

    # Pass 1: reciprocal of the (symmetric) denominators, lane-oriented (1, N).
    inv_denom = pl.pallas_call(
        functools.partial(_denom_kernel, inv_t=inv_t, n_valid=N, tn=tn1),
        out_shape=jax.ShapeDtypeStruct((1, N_pad), jnp.float32),
        grid=(N_pad // tn1,),
        in_specs=[pl.BlockSpec((N_pad, Dp), lambda k: (0, 0))],
        out_specs=pl.BlockSpec((1, tn1), lambda k: (0, k)),
        compiler_params=params(("parallel",)),
        cost_estimate=pl.CostEstimate(
            flops=2 * N_pad * N_pad * Dp + 2 * N_pad * N_pad,
            transcendentals=N_pad * N_pad,
            bytes_accessed=N_pad * Dp * z_b + N_pad * 4),
    )(Zp)

    # Pass 2: (row tile, col tile) grid; accumulate p_adj @ Z over col tiles.
    h, alpha = pl.pallas_call(
        functools.partial(_row_kernel, beta=beta, inv_t=inv_t, tm=tm, tn=tn),
        out_shape=(jax.ShapeDtypeStruct((N_pad, Dp), Z.dtype),
                   jax.ShapeDtypeStruct((N_pad, N_pad), jnp.float32)),
        grid=(N_pad // tm, N_pad // tn),
        in_specs=[pl.BlockSpec((1, tn), lambda i, k: (0, k)),
                  pl.BlockSpec((N_pad, Dp), lambda i, k: (0, 0)),
                  pl.BlockSpec((tm, tn), lambda i, k: (i, k))],
        out_specs=(pl.BlockSpec((tm, Dp), lambda i, k: (i, 0)),
                   pl.BlockSpec((tm, tn), lambda i, k: (i, k))),
        scratch_shapes=[pltpu.VMEM((tm, Dp), jnp.float32)],
        compiler_params=params(("parallel", "arbitrary")),
        cost_estimate=pl.CostEstimate(
            flops=4 * N_pad * N_pad * Dp + 6 * N_pad * N_pad,
            transcendentals=N_pad * N_pad,
            bytes_accessed=(N_pad * N_pad * adj_b + N_pad * N_pad * 4
                            + 2 * N_pad * Dp * z_b + N_pad * 4)),
    )(inv_denom, Zp, adjp)

    h = h[:N, :D]
    alpha = alpha[:N, :N]
    return h, alpha


def _reference(Z, adj, beta, temperature):
    # Pure-JAX reference mirroring the PyTorch code (incl. its broadcast).
    temp = jnp.exp(jnp.dot(Z, Z.T) / temperature)
    alpha = temp / jnp.sum(temp, axis=1)[None, :]
    p_adj = alpha * adj
    h = beta * Z + (1.0 - beta) * jnp.dot(p_adj, Z)
    return h, alpha


if __name__ == "__main__":
    key = jax.random.PRNGKey(0)
    kz, ka, kz2, ka2, kz3, ka3 = jax.random.split(key, 6)
    beta = 0.5

    # --- Small case: fused single-block path --------------------------------
    N, D = 64, 32
    Z = 0.1 * jax.random.normal(kz, (N, D), dtype=jnp.float32)
    adj = (jax.random.uniform(ka, (N, N)) < 0.2).astype(jnp.float32)
    h, alpha = disentangle_out_layer(Z, adj, beta=beta, temperature=1.0)
    jax.block_until_ready((h, alpha))
    h_r, a_r = _reference(Z, adj, beta, 1.0)
    assert jnp.allclose(h, h_r, atol=1e-5, rtol=1e-4), "h mismatch (fused)"
    assert jnp.allclose(alpha, a_r, atol=1e-5, rtol=1e-4), "alpha mismatch (fused)"

    # --- Aligned case: row/col tiled path (2x2 tile grid, accumulation) -----
    N2, D2 = 256, 32
    Z2 = 0.1 * jax.random.normal(kz2, (N2, D2), dtype=jnp.float32)
    adj2 = (jax.random.uniform(ka2, (N2, N2)) < 0.1).astype(jnp.float32)
    h2, a2 = disentangle_out_layer(Z2, adj2, beta=beta, temperature=1.0,
                                   force_tiled=True, row_tile=128, col_tile=128)
    jax.block_until_ready((h2, a2))
    h2_r, a2_r = _reference(Z2, adj2, beta, 1.0)
    assert jnp.allclose(h2, h2_r, atol=1e-5, rtol=1e-4), "h mismatch (tiled)"
    assert jnp.allclose(a2, a2_r, atol=1e-5, rtol=1e-4), "alpha mismatch (tiled)"

    # --- Unaligned N + temperature != 1: padded tiled path ------------------
    N3, D3 = 200, 48
    Z3 = 0.1 * jax.random.normal(kz3, (N3, D3), dtype=jnp.float32)
    adj3 = (jax.random.uniform(ka3, (N3, N3)) < 0.15).astype(jnp.float32)
    h3, a3 = disentangle_out_layer(Z3, adj3, beta=beta, temperature=0.5,
                                   force_tiled=True, row_tile=128, col_tile=128,
                                   pass1_tile=128)
    jax.block_until_ready((h3, a3))
    h3_r, a3_r = _reference(Z3, adj3, beta, 0.5)
    assert jnp.allclose(h3, h3_r, atol=1e-5, rtol=1e-4), "h mismatch (padded)"
    assert jnp.allclose(a3, a3_r, atol=1e-5, rtol=1e-4), "alpha mismatch (padded)"

    print("KERNEL_OK")
</pallas_src>

<mosaic_0001>
module attributes {stable_mosaic.version = 11 : i64} {
  func.func @_fused_kernel(%arg0: i32, %arg1: memref<64x128xf32, #tpu.memory_space<vmem>>, %arg2: memref<64x64xf32, #tpu.memory_space<vmem>>, %arg3: memref<64x128xf32, #tpu.memory_space<vmem>>, %arg4: memref<64x64xf32, #tpu.memory_space<vmem>>) attributes {dimension_semantics = [#tpu.dimension_semantics<arbitrary>], iteration_bounds = array<i64: 1>, scalar_prefetch = 0 : i64, scratch_operands = 0 : i64, tpu.core_type = #tpu.core_type<tc>, window_params = [{pipeline_mode = #tpu.pipeline_mode<synchronous>, transform_indices = @transform_0, window_bounds = array<i64: 64, 128>}, {pipeline_mode = #tpu.pipeline_mode<synchronous>, transform_indices = @transform_1, window_bounds = array<i64: 64, 64>}, {pipeline_mode = #tpu.pipeline_mode<synchronous>, transform_indices = @transform_2, window_bounds = array<i64: 64, 128>}, {pipeline_mode = #tpu.pipeline_mode<synchronous>, transform_indices = @transform_3, window_bounds = array<i64: 64, 64>}]} {
    %c0 = arith.constant 0 : index
    %c0_0 = arith.constant 0 : index
    %0 = vector.load %arg1[%c0, %c0_0] : memref<64x128xf32, #tpu.memory_space<vmem>>, vector<64x128xf32>
    %cst = arith.constant dense<0.000000e+00> : vector<64x64xf32>
    %1 = tpu.matmul %0, %0, %cst {dimension_numbers = #tpu.dot_dimension_numbers<[1], [1], [0], [0], [0, 0, 1, 0], [], []>} : vector<64x128xf32>, vector<64x128xf32>, vector<64x64xf32> -> vector<64x64xf32>
    %2 = math.exp %1 : vector<64x64xf32>
    %cst_1 = arith.constant dense<0.000000e+00> : vector<64xf32>
    %3 = vector.multi_reduction <add>, %2, %cst_1 [0] : vector<64x64xf32> to vector<64xf32>
    %4 = vector.shape_cast %3 : vector<64xf32> to vector<1x64xf32>
    %5 = tpu.reciprocal %4 {approx = true} : vector<1x64xf32> -> vector<1x64xf32>
    %6 = arith.mulf %4, %5 : vector<1x64xf32>
    %cst_2 = arith.constant 2.000000e+00 : f32
    %7 = vector.broadcast %cst_2 : f32 to vector<1x64xf32>
    %8 = arith.subf %7, %6 : vector<1x64xf32>
    %9 = arith.mulf %5, %8 : vector<1x64xf32>
    %10 = vector.broadcast %9 : vector<1x64xf32> to vector<64x64xf32>
    %11 = arith.mulf %2, %10 : vector<64x64xf32>
    %c0_3 = arith.constant 0 : index
    %c0_4 = arith.constant 0 : index
    %12 = vector.load %arg4[%c0_3, %c0_4] : memref<64x64xf32, #tpu.memory_space<vmem>>, vector<64x64xf32>
    tpu.vector_store %arg4[%c0_3, %c0_4], %11 {strides = array<i32>} : memref<64x64xf32, #tpu.memory_space<vmem>>, vector<64x64xf32>,
    %c0_5 = arith.constant 0 : index
    %c0_6 = arith.constant 0 : index
    %13 = vector.load %arg2[%c0_5, %c0_6] : memref<64x64xf32, #tpu.memory_space<vmem>>, vector<64x64xf32>
    %14 = arith.mulf %11, %13 : vector<64x64xf32>
    %cst_7 = arith.constant 5.000000e-01 : f32
    %15 = vector.broadcast %cst_7 : f32 to vector<64x128xf32>
    %16 = arith.mulf %15, %0 : vector<64x128xf32>
    %cst_8 = arith.constant dense<0.000000e+00> : vector<64x128xf32>
    %17 = tpu.matmul %14, %0, %cst_8 {dimension_numbers = #tpu.dot_dimension_numbers<[1], [0], [0], [1], [0, 0, 1, 1], [], []>} : vector<64x64xf32>, vector<64x128xf32>, vector<64x128xf32> -> vector<64x128xf32>
    %cst_9 = arith.constant 5.000000e-01 : f32
    %18 = vector.broadcast %cst_9 : f32 to vector<64x128xf32>
    %19 = arith.mulf %18, %17 : vector<64x128xf32>
    %20 = arith.addf %16, %19 : vector<64x128xf32>
    %c0_10 = arith.constant 0 : index
    %c0_11 = arith.constant 0 : index
    %21 = vector.load %arg3[%c0_10, %c0_11] : memref<64x128xf32, #tpu.memory_space<vmem>>, vector<64x128xf32>
    tpu.vector_store %arg3[%c0_10, %c0_11], %20 {strides = array<i32>} : memref<64x128xf32, #tpu.memory_space<vmem>>, vector<64x128xf32>,
    return
  }
  func.func @transform_0(%arg0: i32) -> (i32, i32) {
    %c0_i32 = arith.constant 0 : i32
    %c0_i32_0 = arith.constant 0 : i32
    %c0_i32_1 = arith.constant 0 : i32
    return %c0_i32, %c0_i32_0 : i32, i32
  }
  func.func @transform_1(%arg0: i32) -> (i32, i32) {
    %c0_i32 = arith.constant 0 : i32
    %c0_i32_0 = arith.constant 0 : i32
    %c0_i32_1 = arith.constant 0 : i32
    return %c0_i32, %c0_i32_0 : i32, i32
  }
  func.func @transform_2(%arg0: i32) -> (i32, i32) {
    %c0_i32 = arith.constant 0 : i32
    %c0_i32_0 = arith.constant 0 : i32
    %c0_i32_1 = arith.constant 0 : i32
    return %c0_i32, %c0_i32_0 : i32, i32
  }
  func.func @transform_3(%arg0: i32) -> (i32, i32) {
    %c0_i32 = arith.constant 0 : i32
    %c0_i32_0 = arith.constant 0 : i32
    %c0_i32_1 = arith.constant 0 : i32
    return %c0_i32, %c0_i32_0 : i32, i32
  }
}

</mosaic_0001>

<bundles_post_ra>
// kernel: tpu_custom_call.1
= control target key start
LH: loop header
LB: loop body
LE: loop exit
PB: predicated region body
PF: predicated region fallthrough
CT: control target
= control target key end

     0   :  { %9 = vsyncpa [#allocation3], 0  ;;  %s771_s0 = inlined_call_operand.hbm [shape: f32[64,128], index: 0, kind: input, shape index: {}]   ;;  %s772_s1 = inlined_call_operand.hbm [shape: f32[64,64], index: 1, kind: input, shape index: {}]   ;;  %s773_s2 = inlined_call_operand.hbm [shape: f32[64,128], index: 2, kind: output, shape index: {0}]   ;;  %s774_s3 = inlined_call_operand.hbm [shape: f32[64,64], index: 3, kind: output, shape index: {1}]  }
   0x1   :  { %10 = vsyncpa [#allocation6], 0 }
   0x2   :  { %11 = vsyncpa [#allocation4], 0 }
   0x3   :  { %12 = vsyncpa [#allocation9], 0  ;;  %s633_s12 = smov [#allocation2]  }
   0x4   :  { %s18_s13 = sshll.u32 %s633_s12, 4  ;;  %s19_s13 = int_to_ptr.vmem [resolvable:$true] %s18_s13 }
   0x5   :  { %s553_s14 = scalar_lea.vmem %s19_s13, 1024  ;;  %p558_p1 = scmp.lt.s32.totalorder %s19_s13, %s19_s13 }
   0x6   :  { %p554_p0 = scmp.ne.s32.totalorder %s19_s13, %s553_s14  ;;  %p559_p2 = scmp.lt.s32.totalorder %s553_s14, %s553_s14 }
   0x8   :  { %p560_p3 = por %p559_p2, %p558_p1 }
   0xa   :  { %p561_p4 = pnand %p560_p3, %p554_p0 }
   0xc   :  { %564 = shalt.err (!%p561_p4)
}
   0xd   :  { %s634_s15 = smov 128   ;;  %s635_s16 = smov 8  }
   0xe   :  { %24 = dma.hbm_to_vmem [thread:$0]  %s771_s0, 1024, %s19_s13, [#allocation3], %s634_s15, %s634_s15, %s635_s16  }
   0xf   :  { %s636_s19 = smov [#allocation5]  }
  0x10   :  { %s30_s20 = sshll.u32 %s636_s19, 4  ;;  %s31_s20 = int_to_ptr.vmem [resolvable:$true] %s30_s20 }
  0x11   :  { %s573_s21 = scalar_lea.vmem %s31_s20, 1024  ;;  %p578_p6 = scmp.lt.s32.totalorder %s31_s20, %s31_s20 }
  0x12   :  { %p574_p5 = scmp.ne.s32.totalorder %s31_s20, %s573_s21  ;;  %p579_p7 = scmp.lt.s32.totalorder %s573_s21, %s573_s21 }
  0x14   :  { %p580_p8 = por %p579_p7, %p578_p6 }
  0x16   :  { %p581_p9 = pnand %p580_p8, %p574_p5 }
  0x18   :  { %584 = shalt.err (!%p581_p9)
}
  0x19   :  { %36 = dma.hbm_to_vmem [thread:$0]  %s772_s1, 1024, %s31_s20, [#allocation6], %s634_s15, %s634_s15, %s635_s16  }
  0x1a   :  { %625 = dma.done.wait [#allocation3], 1024  }
  0x1b   :  { %626 = vsyncadd [#allocation3], 4294966272 }
  0x1c   :  { %627 = dma.done.wait [#allocation6], 1024  }
  0x1d   :  { %628 = vsyncadd [#allocation6], 4294966272  ;;  %v671_v0 = vld [vmem:[#allocation2 + $0x38] sm:$0xff]  ;;  %v673_v1 = vld [vmem:[#allocation2 + $0x30] sm:$0xff]  ;;  %vm172_vm0 = vcmask 523264   ;;  %s637_s0 = smov [#allocation8]  }
  0x1e   :  { %465 = vmatprep.subr.mxu0 %v671_v0  ;;  %493 = vmatprep.subr.mxu1 %v671_v0  ;;  %v678_v2 = vld [vmem:[#allocation2] sm:$0xff]  ;;  %v683_v3 = vld [vmem:[#allocation2 + $0x28] sm:$0xff]  ;;  %v694_v5 = vld [vmem:[#allocation2 + $0x18] sm:$0xff]  ;;  %s408_s1 = sshll.u32 %s637_s0, 4  ;;  %s409_s1 = int_to_ptr.vmem [resolvable:$true] %s408_s1 }
  0x1f   :  { %466 = vmatpush3.xpose.msra.mxu0 %v671_v0  ;;  %494 = vmatpush3.msra.mxu1 %v671_v0  ;;  %v690_v4 = vld [vmem:[#allocation2 + $0x20] sm:$0xff]  ;;  %v700_v6 = vld [vmem:[#allocation2 + $0x10] sm:$0xff]  ;;  %v704_v7 = vld [vmem:[#allocation2 + $0x8] sm:$0xff]  ;;  %s585_s24 = scalar_lea.vmem %s409_s1, 1024  ;;  %p590_p11 = scmp.lt.s32.totalorder %s409_s1, %s409_s1 }
  0x20   :  { %467 = vmatprep.subr.mxu0 %v673_v1  ;;  %481 = vmatprep.mubr.f32.mxu0 %v678_v2  ;;  %v214_v57 = vld [vmem:[#allocation5] sm:$0xff]  ;;  %v215_v58 = vld [vmem:[#allocation5 + $0x8] sm:$0xff]  ;;  %v216_v63 = vld [vmem:[#allocation5 + $0x10] sm:$0xff]  ;;  %p586_p10 = scmp.ne.s32.totalorder %s409_s1, %s585_s24  ;;  %p591_p12 = scmp.lt.s32.totalorder %s585_s24, %s585_s24 }
  0x21   :  { %495 = vmatprep.subr.mxu1 %v673_v1 }
  0x22   :  { %496 = vmatpush3.msra.mxu1 %v673_v1  ;;  %p592_p13 = por %p591_p12, %p590_p11 }
  0x23   :  { %468 = vmatpush3.xpose.msra.mxu0 %v673_v1  ;;  %497 = vmatprep.subr.mxu1 %v683_v3 }
  0x24   :  { %469 = vmatprep.subr.mxu0 %v683_v3  ;;  %498 = vmatpush3.msra.mxu1 %v683_v3  ;;  %p593_p0 = pnand %p592_p13, %p586_p10 }
  0x25   :  { %499 = vmatprep.subr.mxu1 %v690_v4 }
  0x26   :  { %500 = vmatpush3.msra.mxu1 %v690_v4 }
  0x27   :  { %470 = vmatpush3.xpose.msra.mxu0 %v683_v3  ;;  %501 = vmatprep.subr.mxu1 %v694_v5 }
  0x28   :  { %471 = vmatprep.subr.mxu0 %v690_v4  ;;  %502 = vmatpush3.msra.mxu1 %v694_v5 }
  0x29   :  { %503 = vmatprep.subr.mxu1 %v700_v6 }
  0x2a   :  { %504 = vmatpush3.msra.mxu1 %v700_v6 }
  0x2b   :  { %472 = vmatpush3.xpose.msra.mxu0 %v690_v4  ;;  %505 = vmatprep.subr.mxu1 %v704_v7 }
  0x2c   :  { %473 = vmatprep.subr.mxu0 %v694_v5  ;;  %506 = vmatpush3.msra.mxu1 %v704_v7 }
  0x2d   :  { %507 = vmatprep.subr.mxu1 %v678_v2 }
  0x2e   :  { %508 = vmatpush3.msra.mxu1 %v678_v2 }
  0x2f   :  { %474 = vmatpush3.xpose.msra.mxu0 %v694_v5 }
  0x30   :  { %475 = vmatprep.subr.mxu0 %v700_v6 }
  0x33   :  { %476 = vmatpush3.xpose.msra.mxu0 %v700_v6 }
  0x34   :  { %477 = vmatprep.subr.mxu0 %v704_v7 }
  0x37   :  { %478 = vmatpush3.xpose.msra.mxu0 %v704_v7 }
  0x38   :  { %479 = vmatprep.subr.mxu0 %v678_v2 }
  0x3b   :  { %480 = vmatpush3.xpose.msra.mxu0 %v678_v2 }
  0x3e   :  { %482 = vmatmul.mubr.f32.vlgmr.msra.gmra.mxu0 %v704_v7 }
  0x3f   :  { %484 = vmatprep.mubr.f32.mxu0 %v700_v6 }
  0x42   :  { %485 = vmatmul.mubr.f32.gmra.mxu0 %v694_v5 }
  0x43   :  { %487 = vmatprep.mubr.f32.mxu0 %v690_v4 }
  0x46   :  { %488 = vmatmul.mubr.f32.gmra.mxu0 %v683_v3 }
  0x47   :  { %490 = vmatprep.mubr.f32.mxu0 %v673_v1 }
  0x4a   :  { %491 = vmatmul.mubr.f32.gmra.mxu0 %v671_v0 }
  0xfe   :  { %v483_v8 = vpop.f32.mrf.mxu0 }
  0xff   :  { %v158_v9 = vmul.f32 1.442695, %v483_v8 }
 0x100   :  { %v117_v10 = vpop.f32.mrf.mxu0 }
 0x101   :  { %v156_v11 = vmul.f32 1.442695, %v117_v10  ;;  %527 = vpow2.f32 %v158_v9 }
 0x102   :  { %v486_v12 = vpop.f32.mrf.mxu0 }
 0x103   :  { %529 = vpow2.f32 %v156_v11  ;;  %v162_v13 = vmul.f32 1.442695, %v486_v12 }
 0x104   :  { %v127_v14 = vpop.f32.mrf.mxu0 }
 0x105   :  { %v160_v15 = vmul.f32 1.442695, %v127_v14  ;;  %531 = vpow2.f32 %v162_v13 }
 0x106   :  { %v489_v16 = vpop.f32.mrf.mxu0 }
 0x107   :  { %533 = vpow2.f32 %v160_v15  ;;  %v166_v17 = vmul.f32 1.442695, %v489_v16  ;;  %v217_v15 = vld [vmem:[#allocation5 + $0x18] sm:$0xff]  ;;  %v218_v16 = vld [vmem:[#allocation5 + $0x20] sm:$0xff] }
 0x108   :  { %v137_v18 = vpop.f32.mrf.mxu0 }
 0x109   :  { %v164_v19 = vmul.f32 1.442695, %v137_v18  ;;  %535 = vpow2.f32 %v166_v17 }
 0x10a   :  { %v492_v20 = vpop.f32.mrf.mxu0 }
 0x10b   :  { %537 = vpow2.f32 %v164_v19  ;;  %v170_v21 = vmul.f32 1.442695, %v492_v20  ;;  %v219_v19 = vld [vmem:[#allocation5 + $0x28] sm:$0xff]  ;;  %v220_v20 = vld [vmem:[#allocation5 + $0x30] sm:$0xff] }
 0x10c   :  { %v147_v22 = vpop.f32.mrf.mxu0 }
 0x10d   :  { %v168_v23 = vmul.f32 1.442695, %v147_v22  ;;  %539 = vpow2.f32 %v170_v21 }
 0x10e   :  { %v528_v24 = vpop.eup %527 }
 0x10f   :  { %541 = vpow2.f32 %v168_v23  ;;  %v174_v28 = vsel %vm172_vm0, %v528_v24, 0.0  ;;  %v221_v23 = vld [vmem:[#allocation5 + $0x38] sm:$0xff] }
 0x110   :  { %v530_v25 = vpop.eup %529 }
 0x111   :  { %v173_v26 = vsel %vm172_vm0, %v530_v25, 0.0 }
 0x112   :  { %v532_v27 = vpop.eup %531  ;;  %v175_v30 = vadd.f32 %v174_v28, %v173_v26 }
 0x113   :  { %v178_v34 = vsel %vm172_vm0, %v532_v27, 0.0 }
 0x114   :  { %v534_v29 = vpop.eup %533 }
 0x115   :  { %v176_v31 = vsel %vm172_vm0, %v534_v29, 0.0 }
 0x116   :  { %v177_v32 = vadd.f32 %v176_v31, %v175_v30  ;;  %v536_v33 = vpop.eup %535 }
 0x117   :  { %v182_v40 = vsel %vm172_vm0, %v536_v33, 0.0 }
 0x118   :  { %v538_v35 = vpop.eup %537  ;;  %v179_v36 = vadd.f32 %v178_v34, %v177_v32 }
 0x119   :  { %v180_v37 = vsel %vm172_vm0, %v538_v35, 0.0 }
 0x11a   :  { %v181_v38 = vadd.f32 %v180_v37, %v179_v36  ;;  %v540_v39 = vpop.eup %539 }
 0x11b   :  { %v186_v45 = vsel %vm172_vm0, %v540_v39, 0.0 }
 0x11c   :  { %v542_v41 = vpop.eup %541  ;;  %v183_v42 = vadd.f32 %v182_v40, %v181_v38 }
 0x11d   :  { %v184_v43 = vsel %vm172_vm0, %v542_v41, 0.0 }
 0x11e   :  { %v185_v44 = vadd.f32 %v184_v43, %v183_v42 }
 0x120   :  { %v187_v46 = vadd.f32 %v186_v45, %v185_v44 }
 0x122   :  { %v188_v47 = vrot.slane %v187_v46, 4 }
 0x124   :  { %v189_v48 = vadd.f32 %v188_v47, %v187_v46 }
 0x126   :  { %v190_v49 = vrot.slane %v189_v48, 2 }
 0x128   :  { %v191_v50 = vadd.f32 %v190_v49, %v189_v48 }
 0x12a   :  { %v192_v51 = vrot.slane %v191_v50, 1 }
 0x12c   :  { %v193_v52 = vadd.f32 %v192_v51, %v191_v50 }
 0x12e   :  { %543 = vrcp.f32 %v193_v52 }
 0x13b   :  { %v544_v53 = vpop.eup %543 }
 0x13c   :  { %v195_v54 = vmul.f32 %v544_v53, %v193_v52 }
 0x13e   :  { %v196_v55 = vsub.f32 2.0, %v195_v54 }
 0x140   :  { %v197_v56 = vmul.f32 %v544_v53, %v196_v55 }
 0x142   :  { %v198_v59 = vmul.f32 %v530_v25, %v197_v56  ;;  %v199_v60 = vmul.f32 %v528_v24, %v197_v56  ;;  %v200_v61 = vmul.f32 %v534_v29, %v197_v56  ;;  %v201_v62 = vmul.f32 %v532_v27, %v197_v56 }
 0x143   :  { %v202_v8 = vmul.f32 %v538_v35, %v197_v56  ;;  %v203_v9 = vmul.f32 %v536_v33, %v197_v56  ;;  %v204_v10 = vmul.f32 %v542_v41, %v197_v56  ;;  %v205_v11 = vmul.f32 %v540_v39, %v197_v56 }
 0x144   :  { %206 = vst.msk [vmem:[#allocation8] sm:$0xff] %vm172_vm0, %v198_v59  ;;  %v222_v12 = vmul.f32 %v214_v57, %v198_v59  ;;  %207 = vst.msk [vmem:[#allocation8 + $0x8] sm:$0xff] %vm172_vm0, %v199_v60  ;;  %v223_v13 = vmul.f32 %v215_v58, %v199_v60  ;;  %v224_v14 = vmul.f32 %v216_v63, %v200_v61 }
 0x145   :  { %208 = vst.msk [vmem:[#allocation8 + $0x10] sm:$0xff] %vm172_vm0, %v200_v61  ;;  %209 = vst.msk [vmem:[#allocation8 + $0x18] sm:$0xff] %vm172_vm0, %v201_v62  ;;  %v225_v17 = vmul.f32 %v217_v15, %v201_v62  ;;  %v226_v18 = vmul.f32 %v218_v16, %v202_v8  ;;  %v227_v21 = vmul.f32 %v219_v19, %v203_v9 }
 0x146   :  { %210 = vst.msk [vmem:[#allocation8 + $0x20] sm:$0xff] %vm172_vm0, %v202_v8  ;;  %211 = vst.msk [vmem:[#allocation8 + $0x28] sm:$0xff] %vm172_vm0, %v203_v9  ;;  %509 = vmatprep.mubr.msk.f32.mxu1 %vm172_vm0, %v222_v12  ;;  %v228_v22 = vmul.f32 %v220_v20, %v204_v10  ;;  %v229_v24 = vmul.f32 %v221_v23, %v205_v11 }
 0x147   :  { %212 = vst.msk [vmem:[#allocation8 + $0x30] sm:$0xff] %vm172_vm0, %v204_v10  ;;  %213 = vst.msk [vmem:[#allocation8 + $0x38] sm:$0xff] %vm172_vm0, %v205_v11  ;;  %510 = vmatmul.mubr.msk.f32.vlgmr.msra.gmra.mxu1 %vm172_vm0, %v223_v13 }
 0x148   :  { %512 = vmatprep.mubr.msk.f32.mxu1 %vm172_vm0, %v224_v14 }
 0x14b   :  { %513 = vmatmul.mubr.msk.f32.gmra.mxu1 %vm172_vm0, %v225_v17 }
 0x14c   :  { %515 = vmatprep.mubr.msk.f32.mxu1 %vm172_vm0, %v226_v18 }
 0x14f   :  { %516 = vmatmul.mubr.msk.f32.gmra.mxu1 %vm172_vm0, %v227_v21 }
 0x150   :  { %518 = vmatprep.mubr.msk.f32.mxu1 %vm172_vm0, %v228_v22 }
 0x153   :  { %519 = vmatmul.mubr.msk.f32.gmra.mxu1 %vm172_vm0, %v229_v24 }
 0x154   :  { %596 = shalt.err (!%p593_p0)
}
 0x155   :  { %414 = dma.vmem_to_hbm [thread:$0]  %s409_s1, 1024, %s774_s3, [#allocation9], %s634_s15, %s634_s15, %s635_s16   ;;  %v231_v25 = vmul.f32 0.5, %v704_v7  ;;  %v230_v28 = vmul.f32 0.5, %v678_v2  ;;  %v233_v32 = vmul.f32 0.5, %v694_v5  ;;  %v232_v36 = vmul.f32 0.5, %v700_v6 }
 0x156   :  { %v235_v7 = vmul.f32 0.5, %v683_v3  ;;  %v234_v42 = vmul.f32 0.5, %v690_v4  ;;  %v237_v45 = vmul.f32 0.5, %v671_v0  ;;  %v236_v48 = vmul.f32 0.5, %v673_v1  ;;  %s638_s3 = smov [#allocation7]  }
 0x157   :  { %s396_s27 = sshll.u32 %s638_s3, 4  ;;  %s397_s27 = int_to_ptr.vmem [resolvable:$true] %s396_s27 }
 0x158   :  { %s605_s28 = scalar_lea.vmem %s397_s27, 1024  ;;  %p610_p2 = scmp.lt.s32.totalorder %s397_s27, %s397_s27 }
 0x159   :  { %p606_p1 = scmp.ne.s32.totalorder %s397_s27, %s605_s28  ;;  %p611_p3 = scmp.lt.s32.totalorder %s605_s28, %s605_s28 }
 0x15b   :  { %p612_p4 = por %p611_p3, %p610_p2 }
 0x15d   :  { %p613_p5 = pnand %p612_p4, %p606_p1 }
 0x207   :  { %v511_v26 = vpop.f32.mrf.mxu1 }
 0x208   :  { %v368_v27 = vmul.f32 0.5, %v511_v26 }
 0x209   :  { %v328_v29 = vpop.f32.mrf.mxu1 }
 0x20a   :  { %v376_v30 = vadd.f32 %v368_v27, %v231_v25  ;;  %v367_v31 = vmul.f32 0.5, %v328_v29 }
 0x20b   :  { %v514_v33 = vpop.f32.mrf.mxu1 }
 0x20c   :  { %384 = vst [vmem:[#allocation7 + $0x8] sm:$0xff] %v376_v30  ;;  %v375_v34 = vadd.f32 %v367_v31, %v230_v28  ;;  %v370_v35 = vmul.f32 0.5, %v514_v33 }
 0x20d   :  { %v338_v37 = vpop.f32.mrf.mxu1 }
 0x20e   :  { %383 = vst [vmem:[#allocation7] sm:$0xff] %v375_v34  ;;  %v378_v38 = vadd.f32 %v370_v35, %v233_v32  ;;  %v369_v39 = vmul.f32 0.5, %v338_v37 }
 0x20f   :  { %v517_v40 = vpop.f32.mrf.mxu1 }
 0x210   :  { %386 = vst [vmem:[#allocation7 + $0x18] sm:$0xff] %v378_v38  ;;  %v377_v2 = vadd.f32 %v369_v39, %v232_v36  ;;  %v372_v41 = vmul.f32 0.5, %v517_v40 }
 0x211   :  { %v348_v43 = vpop.f32.mrf.mxu1 }
 0x212   :  { %385 = vst [vmem:[#allocation7 + $0x10] sm:$0xff] %v377_v2  ;;  %v380_v5 = vadd.f32 %v372_v41, %v235_v7  ;;  %v371_v44 = vmul.f32 0.5, %v348_v43 }
 0x213   :  { %v520_v46 = vpop.f32.mrf.mxu1 }
 0x214   :  { %388 = vst [vmem:[#allocation7 + $0x28] sm:$0xff] %v380_v5  ;;  %v379_v6 = vadd.f32 %v371_v44, %v234_v42  ;;  %v374_v47 = vmul.f32 0.5, %v520_v46 }
 0x215   :  { %v358_v49 = vpop.f32.mrf.mxu1 }
 0x216   :  { %387 = vst [vmem:[#allocation7 + $0x20] sm:$0xff] %v379_v6  ;;  %v382_v3 = vadd.f32 %v374_v47, %v237_v45  ;;  %v373_v50 = vmul.f32 0.5, %v358_v49 }
 0x218   :  { %390 = vst [vmem:[#allocation7 + $0x38] sm:$0xff] %v382_v3  ;;  %v381_v4 = vadd.f32 %v373_v50, %v236_v48 }
 0x21a   :  { %389 = vst [vmem:[#allocation7 + $0x30] sm:$0xff] %v381_v4 }
 0x21b   :  { %616 = shalt.err (!%p613_p5)
}
 0x21c   :  { %402 = dma.vmem_to_hbm [thread:$0]  %s397_s27, 1024, %s773_s2, [#allocation4], %s634_s15, %s634_s15, %s635_s16  }
 0x21d   :  { %629 = dma.done.wait [#allocation4], 1024  }
 0x21e   :  { %630 = vsyncadd [#allocation4], 4294966272 }
 0x21f   :  { %631 = dma.done.wait [#allocation9], 1024  }
 0x220   :  { %632 = vsyncadd [#allocation9], 4294966272 }
 0x221   :  { %421 = vsyncpa [#allocation3], 1 }
 0x222   :  { %422 = vsyncpa [#allocation6], 1 }
 0x223   :  { %423 = vsyncpa [#allocation4], 1 }
 0x224   :  { %424 = vsyncpa [#allocation9], 1 }

</bundles_post_ra>
